<compile_context>
chip_gen: v7x
topology: tpu7x:2x2x1
jax: 0.10.0
libtpu: 0.0.40
codegen_flags: <defaults>
</compile_context>

<pallas_src>
import jax
import jax.numpy as jnp
from jax.experimental import pallas as pl
from jax.experimental.pallas import tpu as pltpu


def _make_ctx_insert_kernel(n_ctx, chunk_bounds):
    """Build the kernel for static n_ctx and static class-chunk boundaries.

    chunk_bounds: tuple of (start_class, num_classes) pairs covering [0, n_cls).
    """

    def kernel(emb_hbm_ref, ctx_hbm_ref, out_hbm_ref, sems):
        # emb_hbm_ref is aliased to out_hbm_ref; it only carries the frozen
        # prefix/suffix rows through the aliasing and is never touched here.
        del emb_hbm_ref
        copies = []
        for j, (start, size) in enumerate(chunk_bounds):
            cp = pltpu.make_async_copy(
                ctx_hbm_ref.at[pl.ds(start, size), :, :],
                out_hbm_ref.at[pl.ds(start, size), pl.ds(1, n_ctx), :],
                sems.at[j],
            )
            cp.start()
            copies.append(cp)
        # Wait only after every chunk DMA is in flight so the engines overlap.
        for cp in copies:
            cp.wait()

    return kernel


def prompt_learner_forward(token_embedding, ctx, *, max_dma_chunks=4):
    """Pallas equivalent of PromptLearner.forward().

    token_embedding: (n_cls, seq, ctx_dim) full token embedding of the
                     tokenized prompts (the buffer token_prefix/token_suffix
                     were sliced from).  This buffer is aliased to the output,
                     so callers should donate it and not reuse it afterwards.
    ctx:             (n_cls, n_ctx, ctx_dim) class-specific contexts, or
                     (n_ctx, ctx_dim) generic context (broadcast like torch).
    returns:         (n_cls, seq, ctx_dim) prompts
                     == concat([prefix, ctx, suffix], axis=1).
    """
    n_cls, seq, d = token_embedding.shape
    if ctx.ndim == 2:
        # Generic context path: broadcast in the wrapper (cold path; the
        # module under test uses class-specific contexts).
        ctx = jnp.broadcast_to(ctx[None], (n_cls,) + ctx.shape)
    ctx = ctx.astype(token_embedding.dtype)
    n_cls_c, n_ctx, d_c = ctx.shape
    assert n_cls_c == n_cls and d_c == d and 1 + n_ctx <= seq

    # Split the class axis into a few chunks so their DMAs run concurrently.
    n_chunks = max(1, min(int(max_dma_chunks), n_cls))
    base, rem = divmod(n_cls, n_chunks)
    chunk_bounds = []
    start = 0
    for j in range(n_chunks):
        size = base + (1 if j < rem else 0)
        if size > 0:
            chunk_bounds.append((start, size))
            start += size
    chunk_bounds = tuple(chunk_bounds)

    kernel = _make_ctx_insert_kernel(n_ctx, chunk_bounds)

    return pl.pallas_call(
        kernel,
        out_shape=jax.ShapeDtypeStruct((n_cls, seq, d), token_embedding.dtype),
        grid=(1,),
        in_specs=[
            pl.BlockSpec(memory_space=pl.ANY),  # aliased embedding (prefix/suffix)
            pl.BlockSpec(memory_space=pl.ANY),  # learned ctx, read via DMA only
        ],
        out_specs=pl.BlockSpec(memory_space=pl.ANY),
        scratch_shapes=[pltpu.SemaphoreType.DMA((len(chunk_bounds),))],
        input_output_aliases={0: 0},
        compiler_params=pltpu.CompilerParams(
            dimension_semantics=("arbitrary",),
        ),
    )(token_embedding, ctx)


if __name__ == "__main__":
    # Small, deterministic shapes consistent with the module:
    #   n_cls classes, n_ctx = 10 learned context tokens,
    #   total sequence length 16 (instead of CLIP's 77),
    #   ctx_dim = 128 (lane-dense; real CLIP uses 512/768, also lane-dense).
    n_cls = 8
    n_ctx = 10
    seq_len = 16
    ctx_dim = 128

    key = jax.random.PRNGKey(0)
    k_ctx, k_emb = jax.random.split(key)

    # nn.init.normal_(ctx_vectors, std=0.02) -- class-specific contexts.
    ctx = 0.02 * jax.random.normal(k_ctx, (n_cls, n_ctx, ctx_dim), dtype=jnp.float32)

    # Deterministic stand-in for clip_model.token_embedding(tokenized_prompts).
    embedding = jax.random.normal(k_emb, (n_cls, seq_len, ctx_dim), dtype=jnp.float32)

    # The module's registered buffers (used only to build the reference here).
    token_prefix = embedding[:, :1, :]
    token_suffix = embedding[:, 1 + n_ctx:, :]
    ref = jnp.concatenate([token_prefix, ctx, token_suffix], axis=1)
    ref = jax.block_until_ready(ref)

    # Donate the embedding so the aliased output reuses its buffer (zero-copy
    # for prefix/suffix).  Do not reuse `embedding` after this call.
    fwd = jax.jit(prompt_learner_forward, donate_argnums=(0,))
    prompts = fwd(embedding, ctx)
    prompts = jax.block_until_ready(prompts)

    assert prompts.shape == (n_cls, seq_len, ctx_dim)
    assert prompts.dtype == ref.dtype
    assert jnp.allclose(prompts, ref), "Pallas output mismatch vs reference"

    print("KERNEL_OK")
</pallas_src>

<mosaic_0001>
module attributes {stable_mosaic.version = 11 : i64} {
  func.func @kernel(%arg0: i32, %arg1: memref<8x16x128xf32, #tpu.memory_space<any>>, %arg2: memref<8x10x128xf32, #tpu.memory_space<any>>, %arg3: memref<8x16x128xf32, #tpu.memory_space<any>>, %arg4: memref<4x!tpu.dma_semaphore, #tpu.memory_space<semaphore_mem>>) attributes {dimension_semantics = [#tpu.dimension_semantics<arbitrary>], iteration_bounds = array<i64: 1>, scalar_prefetch = 0 : i64, scratch_operands = 1 : i64, tpu.core_type = #tpu.core_type<tc>, window_params = [{}, {}, {}]} {
    %c0_i32 = arith.constant 0 : i32
    %c0_i32_0 = arith.constant 0 : i32
    %c0_i32_1 = arith.constant 0 : i32
    %c0_i32_2 = arith.constant 0 : i32
    %0 = tpu.memref_slice %arg2[%c0_i32_0, %c0_i32_1, %c0_i32_2] : memref<8x10x128xf32, #tpu.memory_space<any>> -> memref<2x10x128xf32, #tpu.memory_space<any>>
    %c0_i32_3 = arith.constant 0 : i32
    %c1_i32 = arith.constant 1 : i32
    %c0_i32_4 = arith.constant 0 : i32
    %1 = tpu.memref_slice %arg3[%c0_i32_3, %c1_i32, %c0_i32_4] : memref<8x16x128xf32, #tpu.memory_space<any>> -> memref<2x10x128xf32, #tpu.memory_space<any>>
    %2 = tpu.memref_slice %arg4[%c0_i32] : memref<4x!tpu.dma_semaphore, #tpu.memory_space<semaphore_mem>> -> memref<1x!tpu.dma_semaphore, #tpu.memory_space<semaphore_mem>>
    %3 = tpu.memref_squeeze %2 : memref<1x!tpu.dma_semaphore, #tpu.memory_space<semaphore_mem>> -> memref<!tpu.dma_semaphore, #tpu.memory_space<semaphore_mem>>
    tpu.enqueue_dma source(%0 : memref<2x10x128xf32, #tpu.memory_space<any>>) target(%1 : memref<2x10x128xf32, #tpu.memory_space<any>>) target_semaphore(%3 : memref<!tpu.dma_semaphore, #tpu.memory_space<semaphore_mem>>)
    %c1_i32_5 = arith.constant 1 : i32
    %c2_i32 = arith.constant 2 : i32
    %c0_i32_6 = arith.constant 0 : i32
    %c0_i32_7 = arith.constant 0 : i32
    %4 = tpu.memref_slice %arg2[%c2_i32, %c0_i32_6, %c0_i32_7] : memref<8x10x128xf32, #tpu.memory_space<any>> -> memref<2x10x128xf32, #tpu.memory_space<any>>
    %c2_i32_8 = arith.constant 2 : i32
    %c1_i32_9 = arith.constant 1 : i32
    %c0_i32_10 = arith.constant 0 : i32
    %5 = tpu.memref_slice %arg3[%c2_i32_8, %c1_i32_9, %c0_i32_10] : memref<8x16x128xf32, #tpu.memory_space<any>> -> memref<2x10x128xf32, #tpu.memory_space<any>>
    %6 = tpu.memref_slice %arg4[%c1_i32_5] : memref<4x!tpu.dma_semaphore, #tpu.memory_space<semaphore_mem>> -> memref<1x!tpu.dma_semaphore, #tpu.memory_space<semaphore_mem>>
    %7 = tpu.memref_squeeze %6 : memref<1x!tpu.dma_semaphore, #tpu.memory_space<semaphore_mem>> -> memref<!tpu.dma_semaphore, #tpu.memory_space<semaphore_mem>>
    tpu.enqueue_dma source(%4 : memref<2x10x128xf32, #tpu.memory_space<any>>) target(%5 : memref<2x10x128xf32, #tpu.memory_space<any>>) target_semaphore(%7 : memref<!tpu.dma_semaphore, #tpu.memory_space<semaphore_mem>>)
    %c2_i32_11 = arith.constant 2 : i32
    %c4_i32 = arith.constant 4 : i32
    %c0_i32_12 = arith.constant 0 : i32
    %c0_i32_13 = arith.constant 0 : i32
    %8 = tpu.memref_slice %arg2[%c4_i32, %c0_i32_12, %c0_i32_13] : memref<8x10x128xf32, #tpu.memory_space<any>> -> memref<2x10x128xf32, #tpu.memory_space<any>>
    %c4_i32_14 = arith.constant 4 : i32
    %c1_i32_15 = arith.constant 1 : i32
    %c0_i32_16 = arith.constant 0 : i32
    %9 = tpu.memref_slice %arg3[%c4_i32_14, %c1_i32_15, %c0_i32_16] : memref<8x16x128xf32, #tpu.memory_space<any>> -> memref<2x10x128xf32, #tpu.memory_space<any>>
    %10 = tpu.memref_slice %arg4[%c2_i32_11] : memref<4x!tpu.dma_semaphore, #tpu.memory_space<semaphore_mem>> -> memref<1x!tpu.dma_semaphore, #tpu.memory_space<semaphore_mem>>
    %11 = tpu.memref_squeeze %10 : memref<1x!tpu.dma_semaphore, #tpu.memory_space<semaphore_mem>> -> memref<!tpu.dma_semaphore, #tpu.memory_space<semaphore_mem>>
    tpu.enqueue_dma source(%8 : memref<2x10x128xf32, #tpu.memory_space<any>>) target(%9 : memref<2x10x128xf32, #tpu.memory_space<any>>) target_semaphore(%11 : memref<!tpu.dma_semaphore, #tpu.memory_space<semaphore_mem>>)
    %c3_i32 = arith.constant 3 : i32
    %c6_i32 = arith.constant 6 : i32
    %c0_i32_17 = arith.constant 0 : i32
    %c0_i32_18 = arith.constant 0 : i32
    %12 = tpu.memref_slice %arg2[%c6_i32, %c0_i32_17, %c0_i32_18] : memref<8x10x128xf32, #tpu.memory_space<any>> -> memref<2x10x128xf32, #tpu.memory_space<any>>
    %c6_i32_19 = arith.constant 6 : i32
    %c1_i32_20 = arith.constant 1 : i32
    %c0_i32_21 = arith.constant 0 : i32
    %13 = tpu.memref_slice %arg3[%c6_i32_19, %c1_i32_20, %c0_i32_21] : memref<8x16x128xf32, #tpu.memory_space<any>> -> memref<2x10x128xf32, #tpu.memory_space<any>>
    %14 = tpu.memref_slice %arg4[%c3_i32] : memref<4x!tpu.dma_semaphore, #tpu.memory_space<semaphore_mem>> -> memref<1x!tpu.dma_semaphore, #tpu.memory_space<semaphore_mem>>
    %15 = tpu.memref_squeeze %14 : memref<1x!tpu.dma_semaphore, #tpu.memory_space<semaphore_mem>> -> memref<!tpu.dma_semaphore, #tpu.memory_space<semaphore_mem>>
    tpu.enqueue_dma source(%12 : memref<2x10x128xf32, #tpu.memory_space<any>>) target(%13 : memref<2x10x128xf32, #tpu.memory_space<any>>) target_semaphore(%15 : memref<!tpu.dma_semaphore, #tpu.memory_space<semaphore_mem>>)
    %c0_i32_22 = arith.constant 0 : i32
    %c0_i32_23 = arith.constant 0 : i32
    %c0_i32_24 = arith.constant 0 : i32
    %c0_i32_25 = arith.constant 0 : i32
    %16 = tpu.memref_slice %arg2[%c0_i32_23, %c0_i32_24, %c0_i32_25] : memref<8x10x128xf32, #tpu.memory_space<any>> -> memref<2x10x128xf32, #tpu.memory_space<any>>
    %c0_i32_26 = arith.constant 0 : i32
    %c1_i32_27 = arith.constant 1 : i32
    %c0_i32_28 = arith.constant 0 : i32
    %17 = tpu.memref_slice %arg3[%c0_i32_26, %c1_i32_27, %c0_i32_28] : memref<8x16x128xf32, #tpu.memory_space<any>> -> memref<2x10x128xf32, #tpu.memory_space<any>>
    %18 = tpu.memref_slice %arg4[%c0_i32_22] : memref<4x!tpu.dma_semaphore, #tpu.memory_space<semaphore_mem>> -> memref<1x!tpu.dma_semaphore, #tpu.memory_space<semaphore_mem>>
    %19 = tpu.memref_squeeze %18 : memref<1x!tpu.dma_semaphore, #tpu.memory_space<semaphore_mem>> -> memref<!tpu.dma_semaphore, #tpu.memory_space<semaphore_mem>>
    tpu.wait_dma2 semaphore(%19 : memref<!tpu.dma_semaphore, #tpu.memory_space<semaphore_mem>>) src(%16 : memref<2x10x128xf32, #tpu.memory_space<any>>) dst(%17 : memref<2x10x128xf32, #tpu.memory_space<any>>)
    %c1_i32_29 = arith.constant 1 : i32
    %c2_i32_30 = arith.constant 2 : i32
    %c0_i32_31 = arith.constant 0 : i32
    %c0_i32_32 = arith.constant 0 : i32
    %20 = tpu.memref_slice %arg2[%c2_i32_30, %c0_i32_31, %c0_i32_32] : memref<8x10x128xf32, #tpu.memory_space<any>> -> memref<2x10x128xf32, #tpu.memory_space<any>>
    %c2_i32_33 = arith.constant 2 : i32
    %c1_i32_34 = arith.constant 1 : i32
    %c0_i32_35 = arith.constant 0 : i32
    %21 = tpu.memref_slice %arg3[%c2_i32_33, %c1_i32_34, %c0_i32_35] : memref<8x16x128xf32, #tpu.memory_space<any>> -> memref<2x10x128xf32, #tpu.memory_space<any>>
    %22 = tpu.memref_slice %arg4[%c1_i32_29] : memref<4x!tpu.dma_semaphore, #tpu.memory_space<semaphore_mem>> -> memref<1x!tpu.dma_semaphore, #tpu.memory_space<semaphore_mem>>
    %23 = tpu.memref_squeeze %22 : memref<1x!tpu.dma_semaphore, #tpu.memory_space<semaphore_mem>> -> memref<!tpu.dma_semaphore, #tpu.memory_space<semaphore_mem>>
    tpu.wait_dma2 semaphore(%23 : memref<!tpu.dma_semaphore, #tpu.memory_space<semaphore_mem>>) src(%20 : memref<2x10x128xf32, #tpu.memory_space<any>>) dst(%21 : memref<2x10x128xf32, #tpu.memory_space<any>>)
    %c2_i32_36 = arith.constant 2 : i32
    %c4_i32_37 = arith.constant 4 : i32
    %c0_i32_38 = arith.constant 0 : i32
    %c0_i32_39 = arith.constant 0 : i32
    %24 = tpu.memref_slice %arg2[%c4_i32_37, %c0_i32_38, %c0_i32_39] : memref<8x10x128xf32, #tpu.memory_space<any>> -> memref<2x10x128xf32, #tpu.memory_space<any>>
    %c4_i32_40 = arith.constant 4 : i32
    %c1_i32_41 = arith.constant 1 : i32
    %c0_i32_42 = arith.constant 0 : i32
    %25 = tpu.memref_slice %arg3[%c4_i32_40, %c1_i32_41, %c0_i32_42] : memref<8x16x128xf32, #tpu.memory_space<any>> -> memref<2x10x128xf32, #tpu.memory_space<any>>
    %26 = tpu.memref_slice %arg4[%c2_i32_36] : memref<4x!tpu.dma_semaphore, #tpu.memory_space<semaphore_mem>> -> memref<1x!tpu.dma_semaphore, #tpu.memory_space<semaphore_mem>>
    %27 = tpu.memref_squeeze %26 : memref<1x!tpu.dma_semaphore, #tpu.memory_space<semaphore_mem>> -> memref<!tpu.dma_semaphore, #tpu.memory_space<semaphore_mem>>
    tpu.wait_dma2 semaphore(%27 : memref<!tpu.dma_semaphore, #tpu.memory_space<semaphore_mem>>) src(%24 : memref<2x10x128xf32, #tpu.memory_space<any>>) dst(%25 : memref<2x10x128xf32, #tpu.memory_space<any>>)
    %c3_i32_43 = arith.constant 3 : i32
    %c6_i32_44 = arith.constant 6 : i32
    %c0_i32_45 = arith.constant 0 : i32
    %c0_i32_46 = arith.constant 0 : i32
    %28 = tpu.memref_slice %arg2[%c6_i32_44, %c0_i32_45, %c0_i32_46] : memref<8x10x128xf32, #tpu.memory_space<any>> -> memref<2x10x128xf32, #tpu.memory_space<any>>
    %c6_i32_47 = arith.constant 6 : i32
    %c1_i32_48 = arith.constant 1 : i32
    %c0_i32_49 = arith.constant 0 : i32
    %29 = tpu.memref_slice %arg3[%c6_i32_47, %c1_i32_48, %c0_i32_49] : memref<8x16x128xf32, #tpu.memory_space<any>> -> memref<2x10x128xf32, #tpu.memory_space<any>>
    %30 = tpu.memref_slice %arg4[%c3_i32_43] : memref<4x!tpu.dma_semaphore, #tpu.memory_space<semaphore_mem>> -> memref<1x!tpu.dma_semaphore, #tpu.memory_space<semaphore_mem>>
    %31 = tpu.memref_squeeze %30 : memref<1x!tpu.dma_semaphore, #tpu.memory_space<semaphore_mem>> -> memref<!tpu.dma_semaphore, #tpu.memory_space<semaphore_mem>>
    tpu.wait_dma2 semaphore(%31 : memref<!tpu.dma_semaphore, #tpu.memory_space<semaphore_mem>>) src(%28 : memref<2x10x128xf32, #tpu.memory_space<any>>) dst(%29 : memref<2x10x128xf32, #tpu.memory_space<any>>)
    return
  }
}

</mosaic_0001>

<bundles_post_ra>
// kernel: prompt_learner_forward.1
= control target key start
LH: loop header
LB: loop body
LE: loop exit
PB: predicated region body
PF: predicated region fallthrough
CT: control target
= control target key end

     0   :  { %s291_s0 = inlined_call_operand.hbm [shape: f32[8,16,128], index: 0, kind: input, shape index: {}, may-alias: {0,2}]   ;;  %s292_s1 = inlined_call_operand.vmem [shape: f32[8,10,128], index: 1, kind: input, shape index: {}]   ;;  %s293_s2 = inlined_call_operand.hbm [shape: f32[8,16,128], index: 2, kind: output, shape index: {}, may-alias: {0,2}]  }
   0x1   :  { %s7_s11 = scalar_lea.hbm %s293_s2, 16  ;;  %s9_s14 = sshll.u32 %s292_s1, 4  ;;  %s211_s14 = int_to_ptr.vmem [resolvable:$true] %s9_s14 }
   0x2   :  { %s13_s0 = scalar_lea.vmem %s292_s1, 32  ;;  %s80_s17 = scalar_lea.vmem %s211_s14, 320 }
   0x3   :  { %p81_p0 = scmp.ne.s32.totalorder %s211_s14, %s80_s17  ;;  %s219_s18 = scalar_lea.vmem %s211_s14, 2048 }
   0x4   :  { %p85_p1 = scmp.lt.s32.totalorder %s211_s14, %s211_s14  ;;  %p86_p2 = scmp.lt.s32.totalorder %s219_s18, %s80_s17 }
   0x6   :  { %p87_p3 = por %p86_p2, %p85_p1 }
   0x8   :  { %p88_p4 = pnand %p87_p3, %p81_p0 }
   0xa   :  { %91 = shalt.err (!%p88_p4)  }
   0xb   :  { %s104_s21 = scalar_lea.hbm %s293_s2, 336  ;;  %s230_s24 = scalar_lea.hbm %s293_s2, 2048 }
   0xc   :  { %p93_p5 = scmp.ne.s32.totalorder %s7_s11, %s104_s21  ;;  %p95_p6 = scmp.lt.u32.totalorder %s7_s11, %s293_s2 }
   0xd   :  { %p96_p7 = scmp.lt.u32.totalorder %s230_s24, %s104_s21  ;;  %p98_p9 = scmp.lt.u32.totalorder %s104_s21, %s7_s11 }
   0xf   :  { %p97_p8 = por %p96_p7, %p95_p6 }
  0x11   :  { %p99_p10 = por %p98_p9, %p97_p8 }
  0x13   :  { %p100_p11 = pnand %p99_p10, %p93_p5 }
  0x15   :  { %103 = shalt.err (!%p100_p11)  }
  0x16   :  { %s188_s27 = smov 256   ;;  %s189_s28 = smov 10  }
  0x17   :  { %12 = dma.vmem_to_hbm [thread:$0]  %s211_s14, 320, %s7_s11, [#allocation2], %s188_s27, %s188_s27, %s189_s28 }
  0x18   :  { %s14_s3 = scalar_lea.hbm %s293_s2, 528  ;;  %s17_s4 = sshll.u32 %s13_s0, 4  ;;  %s18_s4 = int_to_ptr.vmem [resolvable:$true] %s17_s4 }
  0x19   :  { %s21_s7 = scalar_lea.vmem %s292_s1, 64  ;;  %s105_s8 = scalar_lea.vmem %s18_s4, 320 }
  0x1a   :  { %p106_p12 = scmp.ne.s32.totalorder %s18_s4, %s105_s8  ;;  %p110_p13 = scmp.lt.s32.totalorder %s18_s4, %s211_s14 }
  0x1b   :  { %p111_p0 = scmp.lt.s32.totalorder %s219_s18, %s105_s8 }
  0x1d   :  { %p112_p1 = por %p111_p0, %p110_p13 }
  0x1f   :  { %p113_p2 = pnand %p112_p1, %p106_p12 }
  0x21   :  { %116 = shalt.err (!%p113_p2)  }
  0x22   :  { %s129_s11 = scalar_lea.hbm %s293_s2, 848  ;;  %p120_p4 = scmp.lt.u32.totalorder %s14_s3, %s293_s2 }
  0x23   :  { %p118_p3 = scmp.ne.s32.totalorder %s14_s3, %s129_s11  ;;  %p121_p5 = scmp.lt.u32.totalorder %s230_s24, %s129_s11 }
  0x24   :  { %p123_p7 = scmp.lt.u32.totalorder %s129_s11, %s14_s3 }
  0x25   :  { %p122_p6 = por %p121_p5, %p120_p4 }
  0x27   :  { %p124_p8 = por %p123_p7, %p122_p6 }
  0x29   :  { %p125_p9 = pnand %p124_p8, %p118_p3 }
  0x2b   :  { %128 = shalt.err (!%p125_p9)  }
  0x2c   :  { %20 = dma.vmem_to_hbm [thread:$0]  %s18_s4, 320, %s14_s3, [#allocation2 + $0x1], %s188_s27, %s188_s27, %s189_s28 }
  0x2d   :  { %s22_s0 = scalar_lea.hbm %s293_s2, 1040  ;;  %s25_s17 = sshll.u32 %s21_s7, 4  ;;  %s26_s17 = int_to_ptr.vmem [resolvable:$true] %s25_s17 }
  0x2e   :  { %s29_s21 = scalar_lea.vmem %s292_s1, 96  ;;  %s130_s22 = scalar_lea.vmem %s26_s17, 320 }
  0x2f   :  { %p131_p10 = scmp.ne.s32.totalorder %s26_s17, %s130_s22  ;;  %p135_p11 = scmp.lt.s32.totalorder %s26_s17, %s211_s14 }
  0x30   :  { %p136_p12 = scmp.lt.s32.totalorder %s219_s18, %s130_s22 }
  0x32   :  { %p137_p13 = por %p136_p12, %p135_p11 }
  0x34   :  { %p138_p0 = pnand %p137_p13, %p131_p10 }
  0x36   :  { %141 = shalt.err (!%p138_p0)  }
  0x37   :  { %s154_s26 = scalar_lea.hbm %s293_s2, 1360  ;;  %p145_p2 = scmp.lt.u32.totalorder %s22_s0, %s293_s2 }
  0x38   :  { %p143_p1 = scmp.ne.s32.totalorder %s22_s0, %s154_s26  ;;  %p146_p3 = scmp.lt.u32.totalorder %s230_s24, %s154_s26 }
  0x39   :  { %p148_p5 = scmp.lt.u32.totalorder %s154_s26, %s22_s0 }
  0x3a   :  { %p147_p4 = por %p146_p3, %p145_p2 }
  0x3c   :  { %p149_p6 = por %p148_p5, %p147_p4 }
  0x3e   :  { %p150_p7 = pnand %p149_p6, %p143_p1 }
  0x40   :  { %153 = shalt.err (!%p150_p7)  }
  0x41   :  { %28 = dma.vmem_to_hbm [thread:$0]  %s26_s17, 320, %s22_s0, [#allocation2 + $0x2], %s188_s27, %s188_s27, %s189_s28 }
  0x42   :  { %s30_s4 = scalar_lea.hbm %s293_s2, 1552  ;;  %s33_s5 = sshll.u32 %s29_s21, 4  ;;  %s34_s5 = int_to_ptr.vmem [resolvable:$true] %s33_s5 }
  0x43   :  { %s155_s6 = scalar_lea.vmem %s34_s5, 320  ;;  %p160_p9 = scmp.lt.s32.totalorder %s34_s5, %s211_s14 }
  0x44   :  { %p156_p8 = scmp.ne.s32.totalorder %s34_s5, %s155_s6  ;;  %p161_p10 = scmp.lt.s32.totalorder %s219_s18, %s155_s6 }
  0x46   :  { %p162_p11 = por %p161_p10, %p160_p9 }
  0x48   :  { %p163_p12 = pnand %p162_p11, %p156_p8 }
  0x4a   :  { %166 = shalt.err (!%p163_p12)  }
  0x4b   :  { %s179_s9 = scalar_lea.hbm %s293_s2, 1872  ;;  %p170_p0 = scmp.lt.u32.totalorder %s30_s4, %s293_s2 }
  0x4c   :  { %p168_p13 = scmp.ne.s32.totalorder %s30_s4, %s179_s9  ;;  %p171_p1 = scmp.lt.u32.totalorder %s230_s24, %s179_s9 }
  0x4d   :  { %p173_p3 = scmp.lt.u32.totalorder %s179_s9, %s30_s4 }
  0x4e   :  { %p172_p2 = por %p171_p1, %p170_p0 }
  0x50   :  { %p174_p4 = por %p173_p3, %p172_p2 }
  0x52   :  { %p175_p5 = pnand %p174_p4, %p168_p13 }
  0x54   :  { %178 = shalt.err (!%p175_p5)  }
  0x55   :  { %36 = dma.vmem_to_hbm [thread:$0]  %s34_s5, 320, %s30_s4, [#allocation2 + $0x3], %s188_s27, %s188_s27, %s189_s28 }
  0x56   :  { %180 = dma.done.wait [#allocation2], 320 }
  0x57   :  { %181 = vsyncadd [#allocation2], 4294966976 }
  0x58   :  { %182 = dma.done.wait [#allocation2 + $0x1], 320 }
  0x59   :  { %183 = vsyncadd [#allocation2 + $0x1], 4294966976 }
  0x5a   :  { %184 = dma.done.wait [#allocation2 + $0x2], 320 }
  0x5b   :  { %185 = vsyncadd [#allocation2 + $0x2], 4294966976 }
  0x5c   :  { %186 = dma.done.wait [#allocation2 + $0x3], 320 }
  0x5d   :  { %187 = vsyncadd [#allocation2 + $0x3], 4294966976 }
  0x5e   :  { %47 = vsyncmov [#allocation2] }
  0x61   :  { %s48_s2 = vpop.sfrf %47 }
  0x62   :  { %p74_p6 = scmp.ne.s32.totalorder %s48_s2, 0 }
  0x64   :  { %52 = shalt.err (%p74_p6)  }
  0x65   :  { %54 = vsyncmov [#allocation2 + $0x1] }
  0x68   :  { %s55_s14 = vpop.sfrf %54 }
  0x69   :  { %p75_p7 = scmp.ne.s32.totalorder %s55_s14, 0 }
  0x6b   :  { %59 = shalt.err (%p75_p7)  }
  0x6c   :  { %61 = vsyncmov [#allocation2 + $0x2] }
  0x6f   :  { %s62_s18 = vpop.sfrf %61 }
  0x70   :  { %p76_p8 = scmp.ne.s32.totalorder %s62_s18, 0 }
  0x72   :  { %66 = shalt.err (%p76_p8)  }
  0x73   :  { %68 = vsyncmov [#allocation2 + $0x3] }
  0x76   :  { %s69_s24 = vpop.sfrf %68 }
  0x77   :  { %p77_p9 = scmp.ne.s32.totalorder %s69_s24, 0 }
  0x79   :  { %73 = shalt.err (%p77_p9)  }

</bundles_post_ra>
